<compile_context>
chip_gen: v6e
topology: v6e:2x2x1
jax: 0.10.0
libtpu: 0.0.40
codegen_flags: <defaults>
</compile_context>

<pallas_src>
import math

import jax
import jax.numpy as jnp
from jax import lax
from jax.experimental import pallas as pl
from jax.experimental.pallas import tpu as pltpu


def _round_up(x, m):
    return ((x + m - 1) // m) * m


def _make_info_nce_kernel(d_total, ragged):
    """Kernel factory.

    d_total: true (unpadded) feature dimension D.
    ragged:  static flag -- True iff the last D-tile extends past d_total; the
             out-of-bounds lanes (undefined VMEM contents) are masked to zero.
    """

    def kernel(scale_ref, a_ref, b_ref, loss_ref, gram_acc, sa_acc, sb_acc):
        # scale_ref: (1,)  f32 SMEM (raw logit_scale parameter, pre-clamp/exp)
        # a_ref/b_ref: (B, TK) VMEM tiles (bf16 by default)
        # loss_ref: (1, 2) f32 SMEM -> [loss_a, loss_b]
        # scratch: gram (B,B) f32, sa (B,1) f32, sb (B,1) f32
        k = pl.program_id(0)
        nk = pl.num_programs(0)

        @pl.when(k == 0)
        def _init():
            gram_acc[...] = jnp.zeros_like(gram_acc)
            sa_acc[...] = jnp.zeros_like(sa_acc)
            sb_acc[...] = jnp.zeros_like(sb_acc)

        a = a_ref[...]                        # (B, TK), native dtype
        b = b_ref[...]
        if ragged:
            # Only emitted when D % TK != 0: mask lanes beyond the true D
            # (the last tile's out-of-bounds region holds undefined data).
            tk = a_ref.shape[1]
            col = k * tk + lax.broadcasted_iota(jnp.int32, (1, tk), 1)
            valid = col < d_total
            a = jnp.where(valid, a, 0)
            b = jnp.where(valid, b, 0)

        # Unnormalized Gram tile: A_tile . B_tile^T (contraction on the last
        # dim of both operands -> no transpose materialization), f32 MXU acc.
        gram_acc[...] += lax.dot_general(
            a, b, dimension_numbers=(((1,), (1,)), ((), ())),
            preferred_element_type=jnp.float32)

        # Per-row sums of squares, f32 lane reductions (VPU/XLU slack) -- no
        # extra MXU weight push, no per-tile diagonal work.
        a32 = a.astype(jnp.float32)
        b32 = b.astype(jnp.float32)
        sa_acc[...] += jnp.sum(a32 * a32, axis=1, keepdims=True)   # (B, 1)
        sb_acc[...] += jnp.sum(b32 * b32, axis=1, keepdims=True)   # (B, 1)

        @pl.when(k == nk - 1)
        def _finalize():
            eps = 1e-8  # matches the module's forward(eps=1e-08)
            bsz = gram_acc.shape[0]

            # logit_scale.data = clamp(logit_scale, 0, 4.6052); scale = exp(.)
            scale = jnp.exp(jnp.clip(scale_ref[0], 0.0, 4.6052))

            rows = lax.broadcasted_iota(jnp.int32, (bsz, bsz), 0)
            cols = lax.broadcasted_iota(jnp.int32, (bsz, bsz), 1)
            eye = rows == cols

            # Reciprocal norms via EUP. sum(b^2) gets its one-time
            # sublane->lane relayout here (eye mask + axis-0 reduce).
            inv_a = pl.reciprocal(jnp.sqrt(sa_acc[...]) + eps)          # (B,1)
            sb_row = jnp.sum(eye.astype(jnp.float32) * sb_acc[...],
                             axis=0, keepdims=True)                     # (1,B)
            inv_b_row = pl.reciprocal(jnp.sqrt(sb_row) + eps)           # (1,B)

            # logits_ij = scale * G_ij / ((|a_i|+eps)(|b_j|+eps)), written in
            # place into the gram accumulator (no extra live (B,B) temp).
            gram_acc[...] = (scale * gram_acc[...]) * (inv_a * inv_b_row)
            logits = gram_acc[...]

            # Positive-pair term (shared by both directions) straight from the
            # logits diagonal.
            diag_sum = jnp.sum(jnp.where(eye, logits, 0.0))

            # Row-direction (a -> b) and column-direction (b -> a) LSE.
            row_max = jnp.max(logits, axis=1, keepdims=True)
            lse_row = row_max + jnp.log(
                jnp.sum(jnp.exp(logits - row_max), axis=1, keepdims=True))
            col_max = jnp.max(logits, axis=0, keepdims=True)
            lse_col = col_max + jnp.log(
                jnp.sum(jnp.exp(logits - col_max), axis=0, keepdims=True))

            loss_ref[0, 0] = (jnp.sum(lse_row) - diag_sum) / bsz   # loss_a
            loss_ref[0, 1] = (jnp.sum(lse_col) - diag_sum) / bsz   # loss_b

    return kernel


def info_nce_loss(features_a, features_b, logit_scale, *,
                  single_direction=False, flatten=True,
                  compute_dtype=jnp.bfloat16, tk_cap=2048):
    """Bidirectional InfoNCE loss (world_size == 1 path of the PyTorch module).

    features_a, features_b: (B, C, H, W) arrays (NCHW).
    logit_scale: (1,) f32 parameter (log(1/temperature), pre-clamp).
    compute_dtype: streaming dtype for the kernel inputs (bf16 default: halves
        HBM bytes + fast MXU path; accumulation is always f32). None = native.
    Returns a scalar f32 loss (loss_a + loss_b, or loss_a if single_direction).
    """
    bs_a, bs_b = features_a.shape[0], features_b.shape[0]
    # flatten / channel-mean glue stays in plain JAX (reshape is free).
    if flatten:
        fa = features_a.reshape(bs_a, -1)
        fb = features_b.reshape(bs_b, -1)
    else:
        fa = features_a.reshape(bs_a, features_a.shape[1], -1).mean(-1)
        fb = features_b.reshape(bs_b, features_b.shape[1], -1).mean(-1)
    if bs_a != bs_b or fa.shape[1] != fb.shape[1]:
        raise ValueError("InfoNCE positive pairs require matching (B, D) shapes")

    if compute_dtype is not None:
        fa = fa.astype(compute_dtype)
        fb = fb.astype(compute_dtype)

    B, D = fa.shape
    itemsize = jnp.dtype(fa.dtype).itemsize

    # Generation-aware VMEM budget (~109 MiB usable on v5e/v6e, ~54 MiB v7x).
    try:
        vmem_cap = int(pltpu.get_tpu_info().vmem_capacity_bytes)
    except Exception:
        vmem_cap = 64 << 20
    usable = int(vmem_cap * 0.85)

    sub_b = max(_round_up(B, 16), 16)
    lane_b = max(_round_up(B, 128), 128)
    nbuf = 3 if B <= 256 else 2          # triple-buffer streaming for small B

    def est_vmem(tk_):
        tkp = max(_round_up(tk_, 128), 128)
        return (2 * nbuf * sub_b * tkp * itemsize    # A/B streaming buffers
                + sub_b * lane_b * 4                 # (B,B) gram accumulator
                + 5 * sub_b * lane_b * 4             # finalize temporaries
                + 2 * sub_b * 128 * 4                # sa / sb accumulators
                + (2 << 20))                         # misc headroom

    # VMEM-driven K tile: as large as fits (caps accumulator RMW traffic and
    # amortizes per-grid-step overhead).
    d128 = _round_up(D, 128)
    tk = min(d128, max(_round_up(tk_cap, 128), 128))
    while tk > 128 and est_vmem(tk) > usable:
        tk -= 128

    if tk >= D:
        tk = D            # full-extent block: always layout-legal, no mask
        num_k = 1
        ragged = False
    else:
        num_k = -(-D // tk)
        ragged = (D % tk) != 0   # mask the tail tile in-kernel (no jnp.pad)

    use_buf3 = (nbuf == 3) and (num_k >= 3)

    def tile_spec():
        if use_buf3:
            try:
                return pl.BlockSpec((B, tk), lambda k: (0, k),
                                    pipeline_mode=pl.Buffered(3))
            except TypeError:   # defensive: fall back to default 2-deep
                pass
        return pl.BlockSpec((B, tk), lambda k: (0, k))

    vmem_limit = int(min(max(est_vmem(tk) * 5 // 4, 16 << 20), usable))

    kernel = _make_info_nce_kernel(D, ragged)

    losses = pl.pallas_call(
        kernel,
        out_shape=jax.ShapeDtypeStruct((1, 2), jnp.float32),
        grid=(num_k,),
        in_specs=[
            pl.BlockSpec(memory_space=pltpu.MemorySpace.SMEM),   # logit_scale
            tile_spec(),                                         # A tiles
            tile_spec(),                                         # B tiles
        ],
        out_specs=pl.BlockSpec(memory_space=pltpu.MemorySpace.SMEM),
        scratch_shapes=[
            pltpu.VMEM((B, B), jnp.float32),   # Gram / logits accumulator
            pltpu.VMEM((B, 1), jnp.float32),   # sum(a^2) per row
            pltpu.VMEM((B, 1), jnp.float32),   # sum(b^2) per row
        ],
        compiler_params=pltpu.CompilerParams(
            dimension_semantics=("arbitrary",),   # D is a reduction axis
            vmem_limit_bytes=vmem_limit,
        ),
    )(logit_scale.astype(jnp.float32).reshape(1), fa, fb)

    loss_a = losses[0, 0]
    if single_direction:
        return loss_a
    return loss_a + losses[0, 1]


def _info_nce_reference(features_a, features_b, logit_scale, eps=1e-8,
                        compute_dtype=jnp.bfloat16):
    """Pure-JAX reference mirroring the PyTorch module (flatten=True path),
    with the same input quantization as the kernel wrapper."""
    bs = features_a.shape[0]
    fa = features_a.reshape(bs, -1)
    fb = features_b.reshape(bs, -1)
    if compute_dtype is not None:
        fa = fa.astype(compute_dtype)
        fb = fb.astype(compute_dtype)
    fa = fa.astype(jnp.float32)
    fb = fb.astype(jnp.float32)
    scale = jnp.exp(jnp.clip(logit_scale[0], 0.0, 4.6052))
    fa = fa / (jnp.linalg.norm(fa, axis=1, keepdims=True) + eps)
    fb = fb / (jnp.linalg.norm(fb, axis=1, keepdims=True) + eps)
    logits = scale * (fa @ fb.T)
    idx = jnp.arange(bs)

    def ce(lg):
        lse = jax.scipy.special.logsumexp(lg, axis=1)
        return jnp.mean(lse - lg[idx, idx])

    return ce(logits) + ce(logits.T)


if __name__ == "__main__":
    # Deterministic parameter init, matching InfoNCELoss.__init__(temperature=0.07)
    temperature = 0.07
    logit_scale = jnp.array([math.log(1.0 / temperature)], dtype=jnp.float32)

    key = jax.random.PRNGKey(0)
    ka, kb, kc, kd = jax.random.split(key, 4)

    # Config 1: B=2, C=4, H=W=16 (NCHW) -> D = 1024 (lane-aligned, 1 K-tile).
    fa1 = jax.random.normal(ka, (2, 4, 16, 16), dtype=jnp.float32)
    fb1 = jax.random.normal(kb, (2, 4, 16, 16), dtype=jnp.float32)
    loss1 = info_nce_loss(fa1, fb1, logit_scale)
    jax.block_until_ready(loss1)
    ref1 = _info_nce_reference(fa1, fb1, logit_scale)
    assert jnp.isfinite(loss1), loss1
    assert jnp.allclose(loss1, ref1, rtol=1e-3, atol=1e-3), (float(loss1), float(ref1))

    # Config 2: ragged D = 3*13*13 = 507 with a small K tile -> multi-tile
    # reduction, in-kernel tail masking (no HBM pad copy) and triple-buffered
    # input streaming.
    fa2 = jax.random.normal(kc, (2, 3, 13, 13), dtype=jnp.float32)
    fb2 = jax.random.normal(kd, (2, 3, 13, 13), dtype=jnp.float32)
    loss2 = info_nce_loss(fa2, fb2, logit_scale, tk_cap=128)
    jax.block_until_ready(loss2)
    ref2 = _info_nce_reference(fa2, fb2, logit_scale)
    assert jnp.isfinite(loss2), loss2
    assert jnp.allclose(loss2, ref2, rtol=1e-3, atol=1e-3), (float(loss2), float(ref2))

    print("KERNEL_OK")
</pallas_src>

<mosaic_0001>
module attributes {stable_mosaic.version = 11 : i64} {
  func.func @kernel(%arg0: i32, %arg1: memref<1xf32, #tpu.memory_space<smem>>, %arg2: memref<2x1024xbf16, #tpu.memory_space<vmem>>, %arg3: memref<2x1024xbf16, #tpu.memory_space<vmem>>, %arg4: memref<1x2xf32, #tpu.memory_space<smem>>, %arg5: memref<2x2xf32, #tpu.memory_space<vmem>>, %arg6: memref<2x1xf32, #tpu.memory_space<vmem>>, %arg7: memref<2x1xf32, #tpu.memory_space<vmem>>) attributes {dimension_semantics = [#tpu.dimension_semantics<arbitrary>], iteration_bounds = array<i64: 1>, scalar_prefetch = 0 : i64, scratch_operands = 3 : i64, tpu.core_type = #tpu.core_type<tc>, window_params = [{transform_indices = @transform_0, window_bounds = array<i64: 1>}, {transform_indices = @transform_1, window_bounds = array<i64: 2, 1024>}, {transform_indices = @transform_2, window_bounds = array<i64: 2, 1024>}, {transform_indices = @transform_3, window_bounds = array<i64: 1, 2>}]} {
    %c0_i32 = arith.constant 0 : i32
    %0 = arith.cmpi eq, %arg0, %c0_i32 : i32
    %1 = arith.extui %0 : i1 to i32
    %c0_i32_0 = arith.constant 0 : i32
    %2 = arith.cmpi ne, %1, %c0_i32_0 : i32
    scf.if %2 {
      %cst_20 = arith.constant 0.000000e+00 : f32
      %26 = vector.broadcast %cst_20 : f32 to vector<2x2xf32>
      %c0_21 = arith.constant 0 : index
      %c0_22 = arith.constant 0 : index
      %27 = vector.load %arg5[%c0_21, %c0_22] : memref<2x2xf32, #tpu.memory_space<vmem>>, vector<2x2xf32>
      tpu.vector_store %arg5[%c0_21, %c0_22], %26 {strides = array<i32>} : memref<2x2xf32, #tpu.memory_space<vmem>>, vector<2x2xf32>,
      %cst_23 = arith.constant 0.000000e+00 : f32
      %28 = vector.broadcast %cst_23 : f32 to vector<2x1xf32>
      %c0_24 = arith.constant 0 : index
      %c0_25 = arith.constant 0 : index
      %29 = vector.load %arg6[%c0_24, %c0_25] : memref<2x1xf32, #tpu.memory_space<vmem>>, vector<2x1xf32>
      tpu.vector_store %arg6[%c0_24, %c0_25], %28 {strides = array<i32>} : memref<2x1xf32, #tpu.memory_space<vmem>>, vector<2x1xf32>,
      %cst_26 = arith.constant 0.000000e+00 : f32
      %30 = vector.broadcast %cst_26 : f32 to vector<2x1xf32>
      %c0_27 = arith.constant 0 : index
      %c0_28 = arith.constant 0 : index
      %31 = vector.load %arg7[%c0_27, %c0_28] : memref<2x1xf32, #tpu.memory_space<vmem>>, vector<2x1xf32>
      tpu.vector_store %arg7[%c0_27, %c0_28], %30 {strides = array<i32>} : memref<2x1xf32, #tpu.memory_space<vmem>>, vector<2x1xf32>,
    } else {
    }
    %c0 = arith.constant 0 : index
    %c0_1 = arith.constant 0 : index
    %3 = vector.load %arg2[%c0, %c0_1] : memref<2x1024xbf16, #tpu.memory_space<vmem>>, vector<2x1024xbf16>
    %c0_2 = arith.constant 0 : index
    %c0_3 = arith.constant 0 : index
    %4 = vector.load %arg3[%c0_2, %c0_3] : memref<2x1024xbf16, #tpu.memory_space<vmem>>, vector<2x1024xbf16>
    %c0_4 = arith.constant 0 : index
    %c0_5 = arith.constant 0 : index
    %5 = vector.load %arg5[%c0_4, %c0_5] : memref<2x2xf32, #tpu.memory_space<vmem>>, vector<2x2xf32>
    %cst = arith.constant dense<0.000000e+00> : vector<2x2xf32>
    %6 = tpu.matmul %3, %4, %cst {dimension_numbers = #tpu.dot_dimension_numbers<[1], [1], [0], [0], [0, 0, 1, 0], [], []>} : vector<2x1024xbf16>, vector<2x1024xbf16>, vector<2x2xf32> -> vector<2x2xf32>
    %7 = arith.addf %5, %6 : vector<2x2xf32>
    %c0_6 = arith.constant 0 : index
    %c0_7 = arith.constant 0 : index
    %8 = vector.load %arg5[%c0_6, %c0_7] : memref<2x2xf32, #tpu.memory_space<vmem>>, vector<2x2xf32>
    tpu.vector_store %arg5[%c0_6, %c0_7], %7 {strides = array<i32>} : memref<2x2xf32, #tpu.memory_space<vmem>>, vector<2x2xf32>,
    %9 = arith.extf %3 : vector<2x1024xbf16> to vector<2x1024xf32>
    %10 = arith.extf %4 : vector<2x1024xbf16> to vector<2x1024xf32>
    %c0_8 = arith.constant 0 : index
    %c0_9 = arith.constant 0 : index
    %11 = vector.load %arg6[%c0_8, %c0_9] : memref<2x1xf32, #tpu.memory_space<vmem>>, vector<2x1xf32>
    %12 = arith.mulf %9, %9 : vector<2x1024xf32>
    %cst_10 = arith.constant dense<0.000000e+00> : vector<2xf32>
    %13 = vector.multi_reduction <add>, %12, %cst_10 [1] : vector<2x1024xf32> to vector<2xf32>
    %14 = vector.shape_cast %13 : vector<2xf32> to vector<2x1xf32>
    %15 = arith.addf %11, %14 : vector<2x1xf32>
    %c0_11 = arith.constant 0 : index
    %c0_12 = arith.constant 0 : index
    %16 = vector.load %arg6[%c0_11, %c0_12] : memref<2x1xf32, #tpu.memory_space<vmem>>, vector<2x1xf32>
    tpu.vector_store %arg6[%c0_11, %c0_12], %15 {strides = array<i32>} : memref<2x1xf32, #tpu.memory_space<vmem>>, vector<2x1xf32>,
    %c0_13 = arith.constant 0 : index
    %c0_14 = arith.constant 0 : index
    %17 = vector.load %arg7[%c0_13, %c0_14] : memref<2x1xf32, #tpu.memory_space<vmem>>, vector<2x1xf32>
    %18 = arith.mulf %10, %10 : vector<2x1024xf32>
    %cst_15 = arith.constant dense<0.000000e+00> : vector<2xf32>
    %19 = vector.multi_reduction <add>, %18, %cst_15 [1] : vector<2x1024xf32> to vector<2xf32>
    %20 = vector.shape_cast %19 : vector<2xf32> to vector<2x1xf32>
    %21 = arith.addf %17, %20 : vector<2x1xf32>
    %c0_16 = arith.constant 0 : index
    %c0_17 = arith.constant 0 : index
    %22 = vector.load %arg7[%c0_16, %c0_17] : memref<2x1xf32, #tpu.memory_space<vmem>>, vector<2x1xf32>
    tpu.vector_store %arg7[%c0_16, %c0_17], %21 {strides = array<i32>} : memref<2x1xf32, #tpu.memory_space<vmem>>, vector<2x1xf32>,
    %c0_i32_18 = arith.constant 0 : i32
    %23 = arith.cmpi eq, %arg0, %c0_i32_18 : i32
    %24 = arith.extui %23 : i1 to i32
    %c0_i32_19 = arith.constant 0 : i32
    %25 = arith.cmpi ne, %24, %c0_i32_19 : i32
    scf.if %25 {
      %c0_20 = arith.constant 0 : index
      %26 = memref.load %arg1[%c0_20] : memref<1xf32, #tpu.memory_space<smem>>
      %cst_21 = arith.constant 0.000000e+00 : f32
      %cst_22 = arith.constant 4.605200e+00 : f32
      %27 = arith.maximumf %cst_21, %26 : f32
      %28 = arith.minimumf %cst_22, %27 : f32
      %29 = math.exp %28 : f32
      %30 = tpu.iota {dimensions = array<i32: 0>} : vector<2x2xi32>
      %31 = tpu.iota {dimensions = array<i32: 1>} : vector<2x2xi32>
      %32 = arith.cmpi eq, %30, %31 : vector<2x2xi32>
      %c0_23 = arith.constant 0 : index
      %c0_24 = arith.constant 0 : index
      %33 = vector.load %arg6[%c0_23, %c0_24] : memref<2x1xf32, #tpu.memory_space<vmem>>, vector<2x1xf32>
      %34 = math.sqrt %33 : vector<2x1xf32>
      %cst_25 = arith.constant 9.99999993E-9 : f32
      %35 = vector.broadcast %cst_25 : f32 to vector<2x1xf32>
      %36 = arith.addf %34, %35 : vector<2x1xf32>
      %37 = tpu.reciprocal %36 : vector<2x1xf32> -> vector<2x1xf32>
      %38 = arith.extui %32 : vector<2x2xi1> to vector<2x2xi32>
      %39 = arith.sitofp %38 : vector<2x2xi32> to vector<2x2xf32>
      %c0_26 = arith.constant 0 : index
      %c0_27 = arith.constant 0 : index
      %40 = vector.load %arg7[%c0_26, %c0_27] : memref<2x1xf32, #tpu.memory_space<vmem>>, vector<2x1xf32>
      %41 = vector.broadcast %40 : vector<2x1xf32> to vector<2x2xf32>
      %42 = arith.mulf %39, %41 : vector<2x2xf32>
      %cst_28 = arith.constant dense<0.000000e+00> : vector<2xf32>
      %43 = vector.multi_reduction <add>, %42, %cst_28 [0] : vector<2x2xf32> to vector<2xf32>
      %44 = vector.shape_cast %43 : vector<2xf32> to vector<1x2xf32>
      %45 = math.sqrt %44 : vector<1x2xf32>
      %cst_29 = arith.constant 9.99999993E-9 : f32
      %46 = vector.broadcast %cst_29 : f32 to vector<1x2xf32>
      %47 = arith.addf %45, %46 : vector<1x2xf32>
      %48 = tpu.reciprocal %47 : vector<1x2xf32> -> vector<1x2xf32>
      %c0_30 = arith.constant 0 : index
      %c0_31 = arith.constant 0 : index
      %49 = vector.load %arg5[%c0_30, %c0_31] : memref<2x2xf32, #tpu.memory_space<vmem>>, vector<2x2xf32>
      %50 = vector.broadcast %29 : f32 to vector<2x2xf32>
      %51 = arith.mulf %50, %49 : vector<2x2xf32>
      %52 = vector.broadcast %37 : vector<2x1xf32> to vector<2x2xf32>
      %53 = vector.broadcast %48 : vector<1x2xf32> to vector<2x2xf32>
      %54 = arith.mulf %52, %53 : vector<2x2xf32>
      %55 = arith.mulf %51, %54 : vector<2x2xf32>
      %c0_32 = arith.constant 0 : index
      %c0_33 = arith.constant 0 : index
      %56 = vector.load %arg5[%c0_32, %c0_33] : memref<2x2xf32, #tpu.memory_space<vmem>>, vector<2x2xf32>
      tpu.vector_store %arg5[%c0_32, %c0_33], %55 {strides = array<i32>} : memref<2x2xf32, #tpu.memory_space<vmem>>, vector<2x2xf32>,
      %c0_34 = arith.constant 0 : index
      %c0_35 = arith.constant 0 : index
      %57 = vector.load %arg5[%c0_34, %c0_35] : memref<2x2xf32, #tpu.memory_space<vmem>>, vector<2x2xf32>
      %cst_36 = arith.constant 0.000000e+00 : f32
      %58 = vector.broadcast %cst_36 : f32 to vector<2x2xf32>
      %59 = arith.select %32, %57, %58 : vector<2x2xi1>, vector<2x2xf32>
      %60 = vector.shape_cast %59 : vector<2x2xf32> to vector<1x2x2xf32>
      %cst_37 = arith.constant dense<0.000000e+00> : vector<1xf32>
      %61 = vector.multi_reduction <add>, %60, %cst_37 [1, 2] : vector<1x2x2xf32> to vector<1xf32>
      %62 = vector.shape_cast %61 : vector<1xf32> to vector<1x1x1xf32>
      %63 = vector.extract %62[0, 0, 0] : f32 from vector<1x1x1xf32>
      %cst_38 = arith.constant dense<0xFF800000> : vector<2xf32>
      %64 = vector.multi_reduction <maximumf>, %57, %cst_38 [1] : vector<2x2xf32> to vector<2xf32>
      %65 = vector.shape_cast %64 : vector<2xf32> to vector<2x1xf32>
      %66 = vector.broadcast %65 : vector<2x1xf32> to vector<2x2xf32>
      %67 = arith.subf %57, %66 : vector<2x2xf32>
      %68 = math.exp %67 : vector<2x2xf32>
      %cst_39 = arith.constant dense<0.000000e+00> : vector<2xf32>
      %69 = vector.multi_reduction <add>, %68, %cst_39 [1] : vector<2x2xf32> to vector<2xf32>
      %70 = vector.shape_cast %69 : vector<2xf32> to vector<2x1xf32>
      %71 = math.log %70 : vector<2x1xf32>
      %72 = arith.addf %65, %71 : vector<2x1xf32>
      %cst_40 = arith.constant dense<0xFF800000> : vector<2xf32>
      %73 = vector.multi_reduction <maximumf>, %57, %cst_40 [0] : vector<2x2xf32> to vector<2xf32>
      %74 = vector.shape_cast %73 : vector<2xf32> to vector<1x2xf32>
      %75 = vector.broadcast %74 : vector<1x2xf32> to vector<2x2xf32>
      %76 = arith.subf %57, %75 : vector<2x2xf32>
      %77 = math.exp %76 : vector<2x2xf32>
      %cst_41 = arith.constant dense<0.000000e+00> : vector<2xf32>
      %78 = vector.multi_reduction <add>, %77, %cst_41 [0] : vector<2x2xf32> to vector<2xf32>
      %79 = vector.shape_cast %78 : vector<2xf32> to vector<1x2xf32>
      %80 = math.log %79 : vector<1x2xf32>
      %81 = arith.addf %74, %80 : vector<1x2xf32>
      %82 = vector.shape_cast %72 : vector<2x1xf32> to vector<1x2x1xf32>
      %cst_42 = arith.constant dense<0.000000e+00> : vector<1xf32>
      %83 = vector.multi_reduction <add>, %82, %cst_42 [1, 2] : vector<1x2x1xf32> to vector<1xf32>
      %84 = vector.shape_cast %83 : vector<1xf32> to vector<1x1x1xf32>
      %85 = vector.extract %84[0, 0, 0] : f32 from vector<1x1x1xf32>
      %86 = arith.subf %85, %63 : f32
      %cst_43 = arith.constant 2.000000e+00 : f32
      %87 = arith.divf %86, %cst_43 : f32
      %c0_44 = arith.constant 0 : index
      %c0_45 = arith.constant 0 : index
      %88 = memref.load %arg4[%c0_44, %c0_45] : memref<1x2xf32, #tpu.memory_space<smem>>
      memref.store %87, %arg4[%c0_44, %c0_45] : memref<1x2xf32, #tpu.memory_space<smem>>
      %89 = vector.shape_cast %81 : vector<1x2xf32> to vector<1x1x2xf32>
      %cst_46 = arith.constant dense<0.000000e+00> : vector<1xf32>
      %90 = vector.multi_reduction <add>, %89, %cst_46 [1, 2] : vector<1x1x2xf32> to vector<1xf32>
      %91 = vector.shape_cast %90 : vector<1xf32> to vector<1x1x1xf32>
      %92 = vector.extract %91[0, 0, 0] : f32 from vector<1x1x1xf32>
      %93 = arith.subf %92, %63 : f32
      %cst_47 = arith.constant 2.000000e+00 : f32
      %94 = arith.divf %93, %cst_47 : f32
      %c0_48 = arith.constant 0 : index
      %c1 = arith.constant 1 : index
      %95 = memref.load %arg4[%c0_48, %c1] : memref<1x2xf32, #tpu.memory_space<smem>>
      memref.store %94, %arg4[%c0_48, %c1] : memref<1x2xf32, #tpu.memory_space<smem>>
    } else {
    }
    return
  }
  func.func @transform_0(%arg0: i32) -> i32 {
    %c0_i32 = arith.constant 0 : i32
    %c0_i32_0 = arith.constant 0 : i32
    return %c0_i32 : i32
  }
  func.func @transform_1(%arg0: i32) -> (i32, i32) {
    %c0_i32 = arith.constant 0 : i32
    %c0_i32_0 = arith.constant 0 : i32
    return %c0_i32, %arg0 : i32, i32
  }
  func.func @transform_2(%arg0: i32) -> (i32, i32) {
    %c0_i32 = arith.constant 0 : i32
    %c0_i32_0 = arith.constant 0 : i32
    return %c0_i32, %arg0 : i32, i32
  }
  func.func @transform_3(%arg0: i32) -> (i32, i32) {
    %c0_i32 = arith.constant 0 : i32
    %c0_i32_0 = arith.constant 0 : i32
    %c0_i32_1 = arith.constant 0 : i32
    return %c0_i32, %c0_i32_0 : i32, i32
  }
}

</mosaic_0001>

<bundles_post_ra>
// kernel: tpu_custom_call.1
= control target key start
LH: loop header
LB: loop body
LE: loop exit
PB: predicated region body
PF: predicated region fallthrough
CT: control target
= control target key end

     0   :  { %9 = vsyncpa [#allocation7], 0  ;;  %s822_s0 = inlined_call_operand.<no memory space> [shape: f32[1], index: 0, kind: input, shape index: {}]   ;;  %s823_s1 = inlined_call_operand.hbm [shape: bf16[2,1024], index: 1, kind: input, shape index: {}]   ;;  %s824_s2 = inlined_call_operand.hbm [shape: bf16[2,1024], index: 2, kind: input, shape index: {}]   ;;  %s825_s3 = inlined_call_operand.hbm [shape: f32[1,2], index: 3, kind: output, shape index: {}]  }
   0x1   :  { %10 = vsyncpa [#allocation10], 0 }
   0x2   :  { %11 = vsyncpa [#allocation8], 0  ;;  %s716_s12 = smov [#allocation6]   ;;  %s717_s14 = smov [#allocation9]  }
   0x3   :  { %s20_s13 = sshll.u32 %s716_s12, 4  ;;  %s30_s15 = sshll.u32 %s717_s14, 4  ;;  %s21_s13 = int_to_ptr.vmem [resolvable:$true] %s20_s13  ;;  %s31_s15 = int_to_ptr.vmem [resolvable:$true] %s30_s15 }
   0x4   :  { %s670_s16 = scalar_lea.vmem %s21_s13, 128  ;;  %p675_p1 = scmp.lt.s32.totalorder %s21_s13, %s21_s13 }
   0x5   :  { %p671_p0 = scmp.ne.s32.totalorder %s21_s13, %s670_s16  ;;  %p676_p2 = scmp.lt.s32.totalorder %s670_s16, %s670_s16 }
   0x7   :  { %p677_p3 = por %p676_p2, %p675_p1 }
   0x9   :  { %p678_p4 = pnand %p677_p3, %p671_p0 }
   0xb   :  { %681 = shalt.err (!%p678_p4)
}
   0xc   :  { %23 = dma.hbm_to_vmem [thread:$0]  %s823_s1, 128, %s21_s13, [#allocation7]  }
   0xd   :  { %s690_s19 = scalar_lea.vmem %s31_s15, 128  ;;  %p695_p6 = scmp.lt.s32.totalorder %s31_s15, %s31_s15 }
   0xe   :  { %p691_p5 = scmp.ne.s32.totalorder %s31_s15, %s690_s19  ;;  %p696_p7 = scmp.lt.s32.totalorder %s690_s19, %s690_s19 }
  0x10   :  { %p697_p8 = por %p696_p7, %p695_p6 }
  0x12   :  { %p698_p9 = pnand %p697_p8, %p691_p5 }
  0x14   :  { %701 = shalt.err (!%p698_p9)
}
  0x15   :  { %33 = dma.hbm_to_vmem [thread:$0]  %s824_s2, 128, %s31_s15, [#allocation10]  }
  0x16   :  { %710 = dma.done.wait [#allocation7], 128  }
  0x17   :  { %711 = vsyncadd [#allocation7], 4294967168 }
  0x18   :  { %712 = dma.done.wait [#allocation10], 128  }
  0x19   :  { %713 = vsyncadd [#allocation10], 4294967168  ;;  %v58_v0 = vlaneseq  ;;  %v718_v1 = vmov 1966171168   ;;  %v719_v3 = vmov 1983009808  }
  0x1a   :  { %v56_v2 = vunpack.c.l.s4 %v718_v1  ;;  %v343_v4 = vunpack.c.l.s4 %v719_v3  ;;  %vm47_vm0 = vcmask 1024   ;;  %v720_v6 = vmov 0.0   ;;  %v51_v10 = vld [vmem:[#allocation9] sm:$0xff]  ;;  %v761_v11 = vld [vmem:[#allocation6] sm:$0xff]  ;;  %s722_s1 = smov 0.0   ;;  %s724_s6 = smov [#allocation11]  }
  0x1b   :  { %49 = vst.msk [vmem:[#allocation4] sm:$0x3] %vm47_vm0, %v720_v6  ;;  %48 = vst.msk [vmem:[#allocation3] sm:$0x3] %vm47_vm0, %v720_v6  ;;  %v756_v7 = vshrl.u32 %v58_v0, 7  ;;  %v334_v12 = vunpack.c.l.bf16 %v51_v10  ;;  %v335_v13 = vunpack.c.h.bf16 %v51_v10  ;;  %v332_v15 = vunpack.c.l.bf16 %v761_v11  ;;  %s474_s23 = smax.f32 %s722_s1, %s822_s0 }
  0x1c   :  { %v57_v5 = vunpack.c.0.s8 %v56_v2  ;;  %v344_v8 = vunpack.c.0.s8 %v343_v4  ;;  %v333_v16 = vunpack.c.h.bf16 %v761_v11  ;;  %vm383_vm1 = vcmask 1041408   ;;  %s723_s24 = smov 4.6052  }
  0x1d   :  { %v405_v17 = vmul.f32 %v334_v12, %v334_v12  ;;  %v406_v18 = vmul.f32 %v335_v13, %v335_v13  ;;  %v337_v19 = vmul.f32 %v332_v15, %v332_v15  ;;  %v112_v25 = vcombine.high %v51_v10, %v51_v10  ;;  %s475_s25 = smin.f32 %s723_s24, %s474_s23 }
  0x1e   :  { %v759_v9 = vsub.s32 %v57_v5, %v756_v7  ;;  %v347_v14 = vsub.s32 %v344_v8, %v756_v7  ;;  %v338_v26 = vmul.f32 %v333_v16, %v333_v16  ;;  %v54_v29 = vcombine.high %v761_v11, %v761_v11 }
  0x1f   :  { %v409_v22 = vcombine.high %v405_v17, %v405_v17  ;;  %v426_v24 = vcombine.high %v406_v18, %v406_v18  ;;  %v341_v27 = vcombine.high %v337_v19, %v337_v19  ;;  %vm45_vm2 = vcmask 9216  }
  0x20   :  { %v119_v20 = vrot.slane %v51_v10, %v759_v9  ;;  %v61_v21 = vrot.slane %v761_v11, %v759_v9  ;;  %v416_v23 = vrot.slane %v405_v17, %v347_v14  ;;  %v348_v28 = vrot.slane %v337_v19, %v347_v14  ;;  %46 = vst.msk [vmem:[#allocation2] sm:$0x3] %vm45_vm2, %v720_v6 }
  0x21   :  { %v423_v30 = vrot.slane %v409_v22, %v347_v14  ;;  %v433_v32 = vrot.slane %v406_v18, %v347_v14  ;;  %v355_v35 = vrot.slane %v341_v27, %v347_v14  ;;  %v358_v37 = vcombine.high %v338_v26, %v338_v26 }
  0x22   :  { %v424_v31 = vcombine.high %v416_v23, %v416_v23  ;;  %v127_v33 = vcombine.high %v119_v20, %v119_v20  ;;  %v451_v34 = vsel %vm383_vm1, %v416_v23, 0.0  ;;  %v356_v36 = vcombine.high %v348_v28, %v348_v28 }
  0x23   :  { %v425_v38 = vcombine.high %v423_v30, %v423_v30  ;;  %v440_v39 = vrot.slane %v426_v24, %v347_v14  ;;  %v454_v41 = vsel %vm383_vm1, %v423_v30, 0.0  ;;  %v357_v43 = vcombine.high %v355_v35, %v355_v35 }
  0x24   :  { %v452_v40 = vsel %vm383_vm1, %v424_v31, 0.0  ;;  %v365_v44 = vrot.slane %v338_v26, %v347_v14  ;;  %v135_v45 = vrot.slane %v119_v20, %v759_v9  ;;  %v441_v46 = vcombine.high %v433_v32, %v433_v32 }
  0x25   :  { %v453_v42 = vadd.f32 %v452_v40, %v451_v34  ;;  %v456_v47 = vsel %vm383_vm1, %v425_v38, 0.0  ;;  %v69_v48 = vcombine.high %v61_v21, %v61_v21  ;;  %v77_v49 = vrot.slane %v61_v21, %v759_v9  ;;  %v404_v40 = vld [vmem:[#allocation4] sm:$0x3] }
  0x26   :  { %v384_v51 = vsel %vm383_vm1, %v348_v28, 0.0  ;;  %v385_v52 = vsel %vm383_vm1, %v356_v36, 0.0  ;;  %v387_v53 = vsel %vm383_vm1, %v355_v35, 0.0  ;;  %v442_v54 = vcombine.high %v440_v39, %v440_v39 }
  0x27   :  { %v455_v50 = vadd.f32 %v454_v41, %v453_v42  ;;  %v458_v55 = vsel %vm383_vm1, %v433_v32, 0.0  ;;  %v372_v56 = vrot.slane %v358_v37, %v347_v14  ;;  %v386_v57 = vadd.f32 %v385_v52, %v384_v51 }
  0x28   :  { %v373_v59 = vcombine.high %v365_v44, %v365_v44  ;;  %v389_v60 = vsel %vm383_vm1, %v357_v43, 0.0  ;;  %v149_v61 = vrot.slane %v127_v33, %v759_v9  ;;  %v460_v62 = vsel %vm383_vm1, %v441_v46, 0.0  ;;  %v336_v43 = vld [vmem:[#allocation3] sm:$0x3] }
  0x29   :  { %v457_v58 = vadd.f32 %v456_v47, %v455_v50  ;;  %v388_v63 = vadd.f32 %v387_v53, %v386_v57  ;;  %v157_v1 = vcombine.high %v135_v45, %v135_v45  ;;  %v91_v2 = vrot.slane %v69_v48, %v759_v9 }
  0x2a   :  { %v391_v4 = vsel %vm383_vm1, %v365_v44, 0.0  ;;  %183 = vmatprep.subr.bf16.mxu0 %v149_v61  ;;  %v159_v5 = vcombine.high %v149_v61, %v149_v61  ;;  %v126_v8 = vrot.slane %v112_v25, %v759_v9  ;;  %v462_v10 = vsel %vm383_vm1, %v440_v39, 0.0 }
  0x2b   :  { %v459_v3 = vadd.f32 %v458_v55, %v457_v58  ;;  %v390_v11 = vadd.f32 %v389_v60, %v388_v63  ;;  %184 = vmatpush1.bf16.xpose.msra.mxu0 %v135_v45  ;;  %201 = vmatprep.mubr.bf16.mxu0 %v91_v2  ;;  %v101_v12 = vcombine.high %v91_v2, %v91_v2  ;;  %v393_v16 = vsel %vm383_vm1, %v373_v59, 0.0 }
  0x2c   :  { %v68_v13 = vrot.slane %v54_v29, %v759_v9  ;;  %v374_v15 = vcombine.high %v372_v56, %v372_v56  ;;  %223 = vmatprep.subr.bf16.mxu1 %v159_v5  ;;  %v128_v17 = vcombine.high %v126_v8, %v126_v8  ;;  %v464_v18 = vsel %vm383_vm1, %v442_v54, 0.0 }
  0x2d   :  { %v461_v14 = vadd.f32 %v460_v62, %v459_v3  ;;  %v392_v19 = vadd.f32 %v391_v4, %v390_v11  ;;  %224 = vmatpush1.bf16.xpose.msra.mxu1 %v157_v1  ;;  %241 = vmatprep.mubr.bf16.mxu1 %v101_v12  ;;  %v142_v20 = vrot.slane %v126_v8, %v759_v9  ;;  %v395_v23 = vsel %vm383_vm1, %v372_v56, 0.0  ;;  %v52_v4 = vld [vmem:[#allocation2] sm:$0x3] }
  0x2e   :  { %v70_v21 = vcombine.high %v68_v13, %v68_v13  ;;  %v156_v24 = vrot.slane %v128_v17, %v759_v9  ;;  %v397_v28 = vsel %vm383_vm1, %v374_v15, 0.0  ;;  %v99_v29 = vcombine.high %v77_v49, %v77_v49 }
  0x2f   :  { %v463_v22 = vadd.f32 %v462_v10, %v461_v14  ;;  %v394_v25 = vadd.f32 %v393_v16, %v392_v19  ;;  %v158_v32 = vcombine.high %v142_v20, %v142_v20  ;;  %v84_v35 = vrot.slane %v68_v13, %v759_v9 }
  0x30   :  { %v98_v26 = vrot.slane %v70_v21, %v759_v9  ;;  %263 = vmatprep.subr.bf16.mxu0 %v156_v24  ;;  %v160_v30 = vcombine.high %v156_v24, %v156_v24  ;;  %v721_v37 = vmov 0   ;;  %v476_v9 = vstv %s475_s25 }
  0x31   :  { %v465_v27 = vadd.f32 %v464_v18, %v463_v22  ;;  %v396_v31 = vadd.f32 %v395_v23, %v394_v25  ;;  %v100_v36 = vcombine.high %v84_v35, %v84_v35  ;;  %640 = vset.pattern.permute.xlu1 %v721_v37  ;;  %641 = vset.pattern.permute.xlu0 %v721_v37  ;;  %v477_v38 = vmul.f32 1.442695, %v476_v9 }
  0x32   :  { %v102_v33 = vcombine.high %v98_v26, %v98_v26  ;;  %202 = vmatmul.mubr.bf16.vlgmr.msra.gmra.mxu0 %v77_v49  ;;  %303 = vmatprep.subr.bf16.mxu1 %v160_v30  ;;  %v483_v16 = vand.u32 127, %v58_v0  ;;  %vm590_vm8 = vcmask 8192  }
  0x33   :  { %466 = vadd.xlane.f32.xlu0 %v465_v27  ;;  %v398_v34 = vadd.f32 %v397_v28, %v396_v31  ;;  %264 = vmatpush1.bf16.xpose.msra.mxu0 %v142_v20  ;;  %644 = vpow2.f32 %v477_v38 }
  0x34   :  { %242 = vmatmul.mubr.bf16.vlgmr.msra.gmra.mxu1 %v99_v29  ;;  %281 = vmatprep.mubr.bf16.mxu0 %v98_v26  ;;  %vm484_vm5 = vcmp.eq.s32.totalorder %v756_v7, %v483_v16 }
  0x35   :  { %304 = vmatpush1.bf16.xpose.msra.mxu1 %v158_v32  ;;  %321 = vmatprep.mubr.bf16.mxu1 %v102_v33  ;;  %v622_v17 = vsel %vm484_vm5, 1.0, %v720_v6 }
  0x37   :  { %399 = vadd.xlane.f32.xlu0 %v398_v34 }
  0x3a   :  { %282 = vmatmul.mubr.bf16.vlgmr.msra.gmra.mxu0 %v84_v35 }
  0x3c   :  { %322 = vmatmul.mubr.bf16.vlgmr.msra.gmra.mxu1 %v100_v36 }
  0x40   :  { %v645_v39 = vpop.eup %644 }
  0x41   :  { %623 = vpush %v645_v39 }
  0x72   :  { %s624_s0 = spop %623 }
  0x73   :  { %v521_v32 = vstv %s624_s0 }
  0xbc   :  { %v467_v41 = vpop.xlane.xlu0 %466 }
  0xbd   :  { %v468_v42 = vadd.f32 %v467_v41, %v404_v40 }
  0xbf   :  { %469 = vst.msk [vmem:[#allocation4] sm:$0x3] %vm47_vm0, %v468_v42 }
  0xc0   :  { %v400_v44 = vpop.xlane.xlu0 %399 }
  0xc1   :  { %v401_v45 = vadd.f32 %v400_v44, %v336_v43 }
  0xc3   :  { %403 = vst.msk [vmem:[#allocation3] sm:$0x3] %vm47_vm0, %v401_v45 }
  0xc6   :  { %v497_v46 = vld [vmem:[#allocation4] sm:$0x3] }
  0xc7   :  { %500 = vperm.xlu1 %640, %v497_v46  }
  0xca   :  { %v485_v47 = vld [vmem:[#allocation3] sm:$0x3] }
  0xcb   :  { %646 = vrsqrt.f32 %v485_v47  ;;  %vm488_vm3 = vcmp.eq.f32.partialorder %v485_v47, inf  ;;  %v491_v50 = vand.u32 2147483648, %v485_v47  ;;  %vm490_vm4 = vcmp.eq.f32.partialorder %v485_v47, 0.0 }
  0xd8   :  { %v647_v48 = vpop.eup %646 }
  0xd9   :  { %v487_v49 = vmul.f32 %v647_v48, %v485_v47 }
  0xdb   :  { %v489_v51 = vsel %vm488_vm3, %v485_v47, %v487_v49 }
  0xdc   :  { %v492_v52 = vsel %vm490_vm4, %v491_v50, %v489_v51 }
  0xdd   :  { %v493_v53 = vadd.f32 1e-08, %v492_v52 }
  0xdf   :  { %648 = vrcp.f32 %v493_v53 }
  0xec   :  { %v649_v54 = vpop.eup %648 }
  0xed   :  { %525 = vperm.xlu1 %640, %v649_v54  }
  0xf2   :  { %v203_v55 = vpop.f32.mrf.mxu0 }
  0xf4   :  { %v205_v56 = vpop.f32.mrf.mxu0  ;;  %v243_v57 = vpop.f32.mrf.mxu1 }
  0xf5   :  { %v244_v60 = vadd.f32 %v243_v57, %v203_v55 }
  0xf6   :  { %v206_v58 = vpop.f32.mrf.mxu0  ;;  %v245_v59 = vpop.f32.mrf.mxu1 }
  0xf8   :  { %v207_v61 = vpop.f32.mrf.mxu0  ;;  %v246_v62 = vpop.f32.mrf.mxu1 }
  0xfa   :  { %v247_v63 = vpop.f32.mrf.mxu1  ;;  %v283_v1 = vpop.f32.mrf.mxu0 }
  0xfb   :  { %v284_v2 = vadd.f32 %v283_v1, %v244_v60 }
  0xfc   :  { %v285_v3 = vpop.f32.mrf.mxu0  ;;  %v323_v5 = vpop.f32.mrf.mxu1 }
  0xfd   :  { %v324_v8 = vadd.f32 %v323_v5, %v284_v2 }
  0xfe   :  { %v286_v10 = vpop.f32.mrf.mxu0  ;;  %v325_v11 = vpop.f32.mrf.mxu1 }
  0xff   :  { %v329_v12 = vadd.f32 %v324_v8, %v52_v4 }
 0x100   :  { %v287_v13 = vpop.f32.mrf.mxu0  ;;  %v326_v14 = vpop.f32.mrf.mxu1 }
 0x101   :  { %331 = vst.msk [vmem:[#allocation2] sm:$0x3] %vm45_vm2, %v329_v12 }
 0x102   :  { %v327_v15 = vpop.f32.mrf.mxu1 }
 0x108   :  { %v520_v6 = vld [vmem:[#allocation2] sm:$0x3] }
 0x109   :  { %v522_v36 = vmul.f32 %v521_v32, %v520_v6 }
 0x142   :  { %v501_v18 = vpop.permute.xlu1 %500 }
 0x143   :  { %v503_v19 = vmul.f32 %v622_v17, %v501_v18 }
 0x145   :  { %v504_v20 = vsel %vm45_vm2, %v503_v19, 0.0 }
 0x146   :  { %v505_v21 = vrot.slane %v504_v20, 4 }
 0x148   :  { %v506_v22 = vadd.f32 %v505_v21, %v504_v20 }
 0x14a   :  { %v507_v23 = vrot.slane %v506_v22, 2 }
 0x14c   :  { %v508_v24 = vadd.f32 %v507_v23, %v506_v22 }
 0x14e   :  { %v509_v25 = vrot.slane %v508_v24, 1 }
 0x150   :  { %v510_v26 = vadd.f32 %v509_v25, %v508_v24 }
 0x152   :  { %650 = vrsqrt.f32 %v510_v26  ;;  %vm513_vm6 = vcmp.eq.f32.partialorder %v510_v26, inf  ;;  %v516_v0 = vand.u32 2147483648, %v510_v26  ;;  %vm515_vm7 = vcmp.eq.f32.partialorder %v510_v26, 0.0 }
 0x15f   :  { %v651_v27 = vpop.eup %650 }
 0x160   :  { %v512_v28 = vmul.f32 %v651_v27, %v510_v26 }
 0x162   :  { %v514_v29 = vsel %vm513_vm6, %v510_v26, %v512_v28 }
 0x163   :  { %v517_v30 = vsel %vm515_vm7, %v516_v0, %v514_v29 }
 0x164   :  { %v518_v31 = vadd.f32 1e-08, %v517_v30 }
 0x166   :  { %652 = vrcp.f32 %v518_v31 }
 0x168   :  { %v526_v34 = vpop.permute.xlu1 %525 }
 0x173   :  { %v653_v33 = vpop.eup %652 }
 0x174   :  { %v528_v35 = vmul.f32 %v653_v33, %v526_v34 }
 0x176   :  { %v529_v37 = vmul.f32 %v528_v35, %v522_v36 }
 0x178   :  { %530 = vst.msk [vmem:[#allocation2] sm:$0x3] %vm45_vm2, %v529_v37 }
 0x17f   :  { %v531_v9 = vld [vmem:[#allocation2] sm:$0x3] }
 0x180   :  { %v543_v38 = vsel %vm45_vm2, %v531_v9, -inf  ;;  %v532_v39 = vsel %vm484_vm5, %v531_v9, 0.0 }
 0x181   :  { %544 = vmax.xlane.f32.xlu0 %v543_v38  ;;  %v533_v40 = vsel %vm45_vm2, %v532_v39, 0.0  ;;  %v555_v7 = vrot.slane %v543_v38, 4 }
 0x183   :  { %v556_v53 = vmax.f32 %v543_v38, %v555_v7 }
 0x185   :  { %534 = vadd.xlane.f32.xlu0 %v533_v40  ;;  %v557_v54 = vrot.slane %v556_v53, 2 }
 0x187   :  { %v558_v55 = vmax.f32 %v556_v53, %v557_v54 }
 0x189   :  { %v559_v56 = vrot.slane %v558_v55, 1 }
 0x18b   :  { %v560_v57 = vmax.f32 %v558_v55, %v559_v56 }
 0x18d   :  { %v561_v58 = vsub.f32 %v531_v9, %v560_v57 }
 0x18f   :  { %v562_v59 = vmul.f32 1.442695, %v561_v58 }
 0x20a   :  { %v545_v41 = vpop.xlane.xlu0 %544 }
 0x20b   :  { %v546_v42 = vsub.f32 %v531_v9, %v545_v41 }
 0x20d   :  { %v547_v43 = vmul.f32 1.442695, %v546_v42 }
 0x20e   :  { %v535_v44 = vpop.xlane.xlu0 %534 }
 0x20f   :  { %654 = vpow2.f32 %v547_v43  ;;  %v536_v45 = vrot.slane %v535_v44, 4 }
 0x210   :  { %656 = vpow2.f32 %v562_v59 }
 0x211   :  { %v537_v46 = vadd.f32 %v536_v45, %v535_v44 }
 0x213   :  { %v538_v47 = vrot.slane %v537_v46, 2 }
 0x215   :  { %v539_v48 = vadd.f32 %v538_v47, %v537_v46 }
 0x217   :  { %v540_v49 = vrot.slane %v539_v48, 1 }
 0x219   :  { %v541_v50 = vadd.f32 %v540_v49, %v539_v48 }
 0x21b   :  { %625 = vpush %v541_v50 }
 0x21c   :  { %v655_v51 = vpop.eup %654 }
 0x21d   :  { %v549_v52 = vsel %vm45_vm2, %v655_v51, 0.0  ;;  %v657_v60 = vpop.eup %656 }
 0x21e   :  { %550 = vadd.xlane.f32.xlu1 %v549_v52  ;;  %v564_v61 = vsel %vm45_vm2, %v657_v60, 0.0 }
 0x21f   :  { %v565_v62 = vrot.slane %v564_v61, 4 }
 0x221   :  { %v566_v63 = vadd.f32 %v565_v62, %v564_v61 }
 0x223   :  { %v567_v1 = vrot.slane %v566_v63, 2 }
 0x225   :  { %v568_v2 = vadd.f32 %v567_v1, %v566_v63 }
 0x227   :  { %v569_v3 = vrot.slane %v568_v2, 1 }
 0x229   :  { %v570_v4 = vadd.f32 %v569_v3, %v568_v2 }
 0x22b   :  { %658 = vlog2.f32 %v570_v4 }
 0x238   :  { %v659_v8 = vpop.eup %658 }
 0x239   :  { %v572_v12 = vmul.f32 0.6931472, %v659_v8 }
 0x23b   :  { %v573_v15 = vadd.f32 %v572_v12, %v560_v57 }
 0x23d   :  { %v591_v16 = vsel %vm590_vm8, %v573_v15, 0.0 }
 0x24c   :  { %s626_s26 = spop %625 }
 0x2a7   :  { %v551_v5 = vpop.xlane.xlu1 %550 }
 0x2a8   :  { %660 = vlog2.f32 %v551_v5 }
 0x2b5   :  { %v661_v10 = vpop.eup %660 }
 0x2b6   :  { %v553_v11 = vmul.f32 0.6931472, %v661_v10 }
 0x2b8   :  { %v554_v13 = vadd.f32 %v553_v11, %v545_v41 }
 0x2ba   :  { %v574_v14 = vsel %vm47_vm0, %v554_v13, 0.0 }
 0x2bb   :  { %575 = vadd.xlane.f32.xlu0 %v574_v14 }
 0x2bf   :  { %592 = vadd.xlane.f32.xlu0 %v591_v16 }
 0x344   :  { %v576_v17 = vpop.xlane.xlu0 %575 }
 0x345   :  { %v577_v18 = vrot.slane %v576_v17, 4 }
 0x347   :  { %v578_v19 = vadd.f32 %v577_v18, %v576_v17 }
 0x348   :  { %v593_v20 = vpop.xlane.xlu0 %592 }
 0x349   :  { %v579_v21 = vrot.slane %v578_v19, 2  ;;  %v594_v22 = vrot.slane %v593_v20, 4 }
 0x34b   :  { %v595_v23 = vadd.f32 %v594_v22, %v593_v20  ;;  %v580_v24 = vadd.f32 %v579_v21, %v578_v19 }
 0x34d   :  { %v596_v25 = vrot.slane %v595_v23, 2  ;;  %v581_v26 = vrot.slane %v580_v24, 1 }
 0x34f   :  { %v597_v27 = vadd.f32 %v596_v25, %v595_v23  ;;  %v582_v28 = vadd.f32 %v581_v26, %v580_v24 }
 0x351   :  { %627 = vpush %v582_v28  ;;  %v598_v0 = vrot.slane %v597_v27, 1 }
 0x353   :  { %v599_v29 = vadd.f32 %v598_v0, %v597_v27 }
 0x355   :  { %629 = vpush %v599_v29 }
 0x382   :  { %s628_s27 = spop %627 }
 0x383   :  { %s584_s28 = ssub.f32 %s628_s27, %s626_s26 }
 0x385   :  { %s587_s29 = smul.f32 0.5, %s584_s28 }
 0x386   :  { %s630_s30 = spop %629 }
 0x387   :  { %589 = sst [smem:[#allocation11]] %s587_s29 }
 0x388   :  { %s601_s4 = ssub.f32 %s630_s30, %s626_s26 }
 0x38a   :  { %s604_s5 = smul.f32 0.5, %s601_s4 }
 0x38c   :  { %606 = sst [smem:[#allocation11 + $0x1]] %s604_s5 }
 0x38d   :  { %614 = dma.smem_to_hbm %s724_s6, 16, %s825_s3, [#allocation8]  }
 0x38e   :  { %714 = dma.done.wait [#allocation8], 16  }
 0x38f   :  { %715 = vsyncadd [#allocation8], 4294967280 }
 0x390   :  { %618 = sfence }
 0x391   :  { %619 = vsyncpa [#allocation7], 1 }
 0x392   :  { %620 = vsyncpa [#allocation10], 1 }
 0x393   :  { %621 = vsyncpa [#allocation8], 1 }

</bundles_post_ra>
